<compile_context>
chip_gen: v6e
topology: v6e:2x2x1
jax: 0.10.0
libtpu: 0.0.40
codegen_flags: <defaults>
</compile_context>

<pallas_src>
import functools

import numpy as np
import jax
import jax.numpy as jnp
from jax import lax
from jax.experimental import pallas as pl
from jax.experimental.pallas import tpu as pltpu

LEAKY_SLOPE = 0.2
IN_EPS = 1e-5

# Tile caps sized for the smallest VMEM budget (v7x: 64 MiB physical / 32 MiB scoped).
# bf16 A/B tiles + f32 acc/out tile at these caps stay well under 2 MiB per buffer.
TM_CAP = 256
TN_CAP = 256
TK_CAP = 512
VMEM_LIMIT = 32 * 1024 * 1024


def _round_up(x, m):
    return (x + m - 1) // m * m


# ----------------------------- Pallas kernels -----------------------------

def _matmul_kernel(*refs, leaky, has_bias):
    # Tiled (M,K)x(K,N): accumulate over the K grid axis into an f32 VMEM scratch,
    # finalize with optional bias + LeakyReLU(0.2) on the last K block.
    if has_bias:
        a_ref, b_ref, bias_ref, o_ref, acc_ref = refs
    else:
        a_ref, b_ref, o_ref, acc_ref = refs
        bias_ref = None

    @pl.when(pl.program_id(2) == 0)
    def _():
        acc_ref[...] = jnp.zeros_like(acc_ref)

    acc_ref[...] += jnp.dot(a_ref[...], b_ref[...],
                            preferred_element_type=jnp.float32)

    @pl.when(pl.program_id(2) == pl.num_programs(2) - 1)
    def _():
        acc = acc_ref[...]
        if has_bias:
            acc = acc + bias_ref[...]
        if leaky:
            acc = jnp.where(acc >= 0, acc, LEAKY_SLOPE * acc)
        o_ref[...] = acc


def _in_stats_kernel(x_ref, s_ref, ss_ref):
    # Per-(n) instance stats: sum and sum-of-squares over H*W (tiled along the
    # arbitrary hw grid axis), accumulated directly into the resident output blocks.
    @pl.when(pl.program_id(1) == 0)
    def _():
        s_ref[...] = jnp.zeros_like(s_ref)
        ss_ref[...] = jnp.zeros_like(ss_ref)

    x = x_ref[0]                                   # (thw, C)
    s_ref[...] += jnp.sum(x, axis=0, keepdims=True)[None]
    ss_ref[...] += jnp.sum(x * x, axis=0, keepdims=True)[None]


def _in_norm_kernel(x_ref, s_ref, ss_ref, o_ref, *, hw):
    # Normalize + LeakyReLU. Zero-padded HW rows produce values that are sliced off.
    x = x_ref[...]                                 # (1, thw, C)
    mean = s_ref[...] / hw                         # (1, 1, C)
    var = jnp.maximum(ss_ref[...] / hw - mean * mean, 0.0)   # clamp: avoid rsqrt(<0)
    inv = lax.rsqrt(var + IN_EPS)
    y = (x - mean) * inv
    o_ref[...] = jnp.where(y >= 0, y, LEAKY_SLOPE * y)


def _avgpool_kernel(t_ref, r_ref, o_ref):
    # 3x3/s2/p1 AvgPool, count_include_pad=False: sum of the 9 taps times a
    # precomputed reciprocal valid-count. Output is lane-dense along channels.
    s = jnp.sum(t_ref[...], axis=0)                # (rb, C)
    o_ref[...] = s * r_ref[...]                    # r_ref: (rb, 1) broadcast


# ----------------------------- Pallas wrappers -----------------------------

def _pallas_matmul_bias(a, b, bias, leaky):
    """a: (M, K) bf16, b: (K, N) bf16, bias: (N,) f32 or None. Returns (M, N) f32."""
    M, K = a.shape
    _, N = b.shape
    tm = min(TM_CAP, _round_up(M, 8))
    tk = min(TK_CAP, _round_up(K, 128))
    tn = min(TN_CAP, _round_up(N, 128))
    Mp, Kp, Np = _round_up(M, tm), _round_up(K, tk), _round_up(N, tn)

    a = jnp.pad(a, ((0, Mp - M), (0, Kp - K)))     # zeros in the K tail are required
    b = jnp.pad(b, ((0, Kp - K), (0, Np - N)))

    has_bias = bias is not None
    in_specs = [pl.BlockSpec((tm, tk), lambda i, j, k: (i, k)),
                pl.BlockSpec((tk, tn), lambda i, j, k: (k, j))]
    args = [a, b]
    if has_bias:
        biasp = jnp.pad(bias.astype(jnp.float32).reshape(1, N), ((0, 0), (0, Np - N)))
        in_specs.append(pl.BlockSpec((1, tn), lambda i, j, k: (0, j)))
        args.append(biasp)

    out = pl.pallas_call(
        functools.partial(_matmul_kernel, leaky=leaky, has_bias=has_bias),
        grid=(Mp // tm, Np // tn, Kp // tk),
        in_specs=in_specs,
        out_specs=pl.BlockSpec((tm, tn), lambda i, j, k: (i, j)),
        out_shape=jax.ShapeDtypeStruct((Mp, Np), jnp.float32),
        scratch_shapes=[pltpu.VMEM((tm, tn), jnp.float32)],
        compiler_params=pltpu.CompilerParams(
            dimension_semantics=("parallel", "parallel", "arbitrary"),
            vmem_limit_bytes=VMEM_LIMIT),
    )(*args)
    return out[:M, :N]


def instnorm_lrelu_nhwc(x):
    """InstanceNorm2d (affine=False) + LeakyReLU(0.2) on NHWC activations."""
    N, H, W, C = x.shape
    HW = H * W
    xf = x.reshape(N, HW, C)
    thw = min(512, _round_up(HW, 8))
    HWp = _round_up(HW, thw)
    xf = jnp.pad(xf, ((0, 0), (0, HWp - HW), (0, 0)))
    grid = (N, HWp // thw)

    s, ss = pl.pallas_call(
        _in_stats_kernel,
        grid=grid,
        in_specs=[pl.BlockSpec((1, thw, C), lambda n, h: (n, h, 0))],
        out_specs=[pl.BlockSpec((1, 1, C), lambda n, h: (n, 0, 0)),
                   pl.BlockSpec((1, 1, C), lambda n, h: (n, 0, 0))],
        out_shape=[jax.ShapeDtypeStruct((N, 1, C), jnp.float32),
                   jax.ShapeDtypeStruct((N, 1, C), jnp.float32)],
        compiler_params=pltpu.CompilerParams(
            dimension_semantics=("parallel", "arbitrary")),
    )(xf)

    y = pl.pallas_call(
        functools.partial(_in_norm_kernel, hw=float(HW)),
        grid=grid,
        in_specs=[pl.BlockSpec((1, thw, C), lambda n, h: (n, h, 0)),
                  pl.BlockSpec((1, 1, C), lambda n, h: (n, 0, 0)),
                  pl.BlockSpec((1, 1, C), lambda n, h: (n, 0, 0))],
        out_specs=pl.BlockSpec((1, thw, C), lambda n, h: (n, h, 0)),
        out_shape=jax.ShapeDtypeStruct((N, HWp, C), jnp.float32),
        compiler_params=pltpu.CompilerParams(
            dimension_semantics=("parallel", "parallel")),
    )(xf, s, ss)
    return y[:, :HW, :].reshape(N, H, W, C)


def avgpool3x3s2_nhwc(x):
    """AvgPool2d(3, stride=2, padding=1, count_include_pad=False) on NHWC input."""
    N, H, W, C = x.shape
    Ho = (H - 1) // 2 + 1
    Wo = (W - 1) // 2 + 1
    xp = jnp.pad(x, ((0, 0), (1, 1), (1, 1), (0, 0)))

    slabs = []
    for di in range(3):
        for dj in range(3):
            slabs.append(xp[:, di:di + 2 * (Ho - 1) + 1:2,
                               dj:dj + 2 * (Wo - 1) + 1:2, :])
    taps = jnp.stack(slabs, axis=0).reshape(9, N * Ho * Wo, C)

    # Analytic valid-count per output position (depends only on border distance).
    hi = jnp.arange(Ho)
    wi = jnp.arange(Wo)
    rcnt = jnp.minimum(2 * hi + 1, H - 1) - jnp.maximum(2 * hi - 1, 0) + 1
    ccnt = jnp.minimum(2 * wi + 1, W - 1) - jnp.maximum(2 * wi - 1, 0) + 1
    inv_cnt = 1.0 / (rcnt[:, None] * ccnt[None, :]).astype(jnp.float32)   # (Ho, Wo)
    inv_cnt = jnp.broadcast_to(inv_cnt[None], (N, Ho, Wo)).reshape(N * Ho * Wo, 1)

    R = N * Ho * Wo
    rb = min(256, _round_up(R, 8))
    Rp = _round_up(R, rb)
    taps = jnp.pad(taps, ((0, 0), (0, Rp - R), (0, 0)))
    inv_cnt = jnp.pad(inv_cnt, ((0, Rp - R), (0, 0)))

    out = pl.pallas_call(
        _avgpool_kernel,
        grid=(Rp // rb,),
        in_specs=[pl.BlockSpec((9, rb, C), lambda i: (0, i, 0)),
                  pl.BlockSpec((rb, 1), lambda i: (i, 0))],
        out_specs=pl.BlockSpec((rb, C), lambda i: (i, 0)),
        out_shape=jax.ShapeDtypeStruct((Rp, C), jnp.float32),
        compiler_params=pltpu.CompilerParams(dimension_semantics=("parallel",)),
    )(taps, inv_cnt)
    return out[:R].reshape(N, Ho, Wo, C)


# ----------------------------- JAX glue (im2col in NHWC) -----------------------------
# TODO(synk): the 4x4 im2col expansion is still materialized in HBM (plain-JAX gather);
# a fully streamed per-tap K-axis pipeline would remove that ~16x read amplification.

def conv2d_nhwc(x, w, b, stride, padding, leaky, use_bias):
    """x: (N,H,W,C) f32, w: (Cout,Cin,KH,KW) f32 (PyTorch layout). Returns NHWC f32."""
    N, H, W, C = x.shape
    Cout, Cin, KH, KW = w.shape
    Ho = (H + 2 * padding - KH) // stride + 1
    Wo = (W + 2 * padding - KW) // stride + 1

    xb = x.astype(jnp.bfloat16)                    # bf16-native MXU inputs
    xp = jnp.pad(xb, ((0, 0), (padding, padding), (padding, padding), (0, 0)))
    slabs = []
    for di in range(KH):
        for dj in range(KW):
            slabs.append(xp[:, di:di + stride * (Ho - 1) + 1:stride,
                               dj:dj + stride * (Wo - 1) + 1:stride, :])
    patches = jnp.stack(slabs, axis=3)             # (N, Ho, Wo, KH*KW, C)
    patches = patches.reshape(N * Ho * Wo, KH * KW * C)

    wm = jnp.transpose(w, (2, 3, 1, 0)).reshape(KH * KW * Cin, Cout).astype(jnp.bfloat16)
    bias = b if use_bias else None
    out = _pallas_matmul_bias(patches, wm, bias, leaky)      # (M, Cout) f32
    return out.reshape(N, Ho, Wo, Cout)


# ----------------------------- Model -----------------------------

def init_params(key, n_in_channels=3, n_fmaps=64, n_dis=3):
    nf = n_fmaps
    cfgs = [(n_in_channels, nf, 2, 2),
            (nf, 2 * nf, 2, 2),
            (2 * nf, 4 * nf, 2, 2),
            (4 * nf, 8 * nf, 1, 2),
            (8 * nf, 1, 1, 2)]
    params = []
    for _ in range(n_dis):
        layers = []
        for (cin, cout, stride, pad) in cfgs:
            key, kw_, kb_ = jax.random.split(key, 3)
            w = 0.05 * jax.random.normal(kw_, (cout, cin, 4, 4), jnp.float32)
            b = 0.02 * jax.random.normal(kb_, (cout,), jnp.float32)
            layers.append(dict(w=w, b=b, stride=stride, pad=pad))
        params.append(layers)
    return params


def multiscale_discriminator_forward(params, x_nchw):
    """Returns outputs_allD: list[n_dis] of list[5] NCHW arrays (same as PyTorch)."""
    x = jnp.transpose(x_nchw, (0, 2, 3, 1))        # NHWC internal flow
    outputs_allD = []
    for i, layers in enumerate(params):
        if i > 0:
            x = avgpool3x3s2_nhwc(x)
        outs = []
        # layer0: Conv + LeakyReLU
        h = conv2d_nhwc(x, layers[0]["w"], layers[0]["b"],
                        layers[0]["stride"], layers[0]["pad"], leaky=True, use_bias=True)
        outs.append(h)
        # layers1-3: Conv + InstanceNorm2d + LeakyReLU (conv bias dropped: the
        # per-channel bias is exactly cancelled by the instance-norm mean subtraction).
        for l in range(1, 4):
            h = conv2d_nhwc(outs[-1], layers[l]["w"], None,
                            layers[l]["stride"], layers[l]["pad"], leaky=False, use_bias=False)
            h = instnorm_lrelu_nhwc(h)
            outs.append(h)
        # layer4: Conv only
        h = conv2d_nhwc(outs[-1], layers[4]["w"], layers[4]["b"],
                        layers[4]["stride"], layers[4]["pad"], leaky=False, use_bias=True)
        outs.append(h)
        outputs_allD.append([jnp.transpose(o, (0, 3, 1, 2)) for o in outs])
    return outputs_allD


# ----------------------------- Pure-JAX reference (verification only) -----------------------------

def _ref_conv2d(x, w, b, stride, pad, leaky):
    y = lax.conv_general_dilated(
        x.astype(jnp.bfloat16), w.astype(jnp.bfloat16),
        window_strides=(stride, stride),
        padding=[(pad, pad), (pad, pad)],
        dimension_numbers=("NCHW", "OIHW", "NCHW"),
        preferred_element_type=jnp.float32)
    y = y + b[None, :, None, None]
    if leaky:
        y = jnp.where(y >= 0, y, LEAKY_SLOPE * y)
    return y


def _ref_instnorm_lrelu(x):
    mean = x.mean(axis=(2, 3), keepdims=True)
    var = x.var(axis=(2, 3), keepdims=True)        # biased, like InstanceNorm2d
    y = (x - mean) * lax.rsqrt(var + IN_EPS)
    return jnp.where(y >= 0, y, LEAKY_SLOPE * y)


def _ref_avgpool(x):
    win, strd = (1, 1, 3, 3), (1, 1, 2, 2)
    pad = [(0, 0), (0, 0), (1, 1), (1, 1)]
    s = lax.reduce_window(x, 0.0, lax.add, win, strd, pad)
    c = lax.reduce_window(jnp.ones_like(x), 0.0, lax.add, win, strd, pad)
    return s / c


def reference_forward(params, x):
    outputs_allD = []
    for i, layers in enumerate(params):
        if i > 0:
            x = _ref_avgpool(x)
        outs = []
        h = _ref_conv2d(x, layers[0]["w"], layers[0]["b"],
                        layers[0]["stride"], layers[0]["pad"], leaky=True)
        outs.append(h)
        for l in range(1, 4):
            h = _ref_conv2d(outs[-1], layers[l]["w"], layers[l]["b"],
                            layers[l]["stride"], layers[l]["pad"], leaky=False)
            h = _ref_instnorm_lrelu(h)
            outs.append(h)
        h = _ref_conv2d(outs[-1], layers[4]["w"], layers[4]["b"],
                        layers[4]["stride"], layers[4]["pad"], leaky=False)
        outs.append(h)
        outputs_allD.append(outs)
    return outputs_allD


# ----------------------------- Main -----------------------------

if __name__ == "__main__":
    key = jax.random.PRNGKey(0)
    kx, kp = jax.random.split(key)

    # Small, module-consistent shapes: NCHW input, 3 discriminator scales.
    N, C, H, W = 2, 3, 16, 16
    n_fmaps = 16
    n_dis = 3

    x = jax.random.normal(kx, (N, C, H, W), jnp.float32)
    params = init_params(kp, n_in_channels=C, n_fmaps=n_fmaps, n_dis=n_dis)

    outs = multiscale_discriminator_forward(params, x)
    for d_outs in outs:
        for t in d_outs:
            jax.block_until_ready(t)

    # Verify against a pure-JAX (non-Pallas) reference of the same math.
    refs = reference_forward(params, x)
    for d_out, d_ref in zip(outs, refs):
        for o, r in zip(d_out, d_ref):
            np.testing.assert_allclose(np.asarray(o), np.asarray(r), rtol=2e-2, atol=2e-2)

    print("KERNEL_OK")
</pallas_src>

<mosaic_0001>
module attributes {stable_mosaic.version = 11 : i64} {
  func.func @_matmul_kernel(%arg0: i32, %arg1: i32, %arg2: i32, %arg3: memref<168x128xbf16, #tpu.memory_space<vmem>>, %arg4: memref<128x128xbf16, #tpu.memory_space<vmem>>, %arg5: memref<1x128xf32, #tpu.memory_space<vmem>>, %arg6: memref<168x128xf32, #tpu.memory_space<vmem>>, %arg7: memref<168x128xf32, #tpu.memory_space<vmem>>) attributes {dimension_semantics = [#tpu.dimension_semantics<parallel>, #tpu.dimension_semantics<parallel>, #tpu.dimension_semantics<arbitrary>], iteration_bounds = array<i64: 1, 1, 1>, scalar_prefetch = 0 : i64, scratch_operands = 1 : i64, tpu.core_type = #tpu.core_type<tc>, window_params = [{transform_indices = @transform_0, window_bounds = array<i64: 168, 128>}, {transform_indices = @transform_1, window_bounds = array<i64: 128, 128>}, {transform_indices = @transform_2, window_bounds = array<i64: 1, 128>}, {transform_indices = @transform_3, window_bounds = array<i64: 168, 128>}]} {
    %c0_i32 = arith.constant 0 : i32
    %0 = arith.cmpi eq, %arg2, %c0_i32 : i32
    %1 = arith.extui %0 : i1 to i32
    %c0_i32_0 = arith.constant 0 : i32
    %2 = arith.cmpi ne, %1, %c0_i32_0 : i32
    scf.if %2 {
      %cst_10 = arith.constant 0.000000e+00 : f32
      %12 = vector.broadcast %cst_10 : f32 to vector<168x128xf32>
      %c0_11 = arith.constant 0 : index
      %c0_12 = arith.constant 0 : index
      %13 = vector.load %arg7[%c0_11, %c0_12] : memref<168x128xf32, #tpu.memory_space<vmem>>, vector<168x128xf32>
      tpu.vector_store %arg7[%c0_11, %c0_12], %12 {strides = array<i32>} : memref<168x128xf32, #tpu.memory_space<vmem>>, vector<168x128xf32>,
    } else {
    }
    %c0 = arith.constant 0 : index
    %c0_1 = arith.constant 0 : index
    %3 = vector.load %arg7[%c0, %c0_1] : memref<168x128xf32, #tpu.memory_space<vmem>>, vector<168x128xf32>
    %c0_2 = arith.constant 0 : index
    %c0_3 = arith.constant 0 : index
    %4 = vector.load %arg3[%c0_2, %c0_3] : memref<168x128xbf16, #tpu.memory_space<vmem>>, vector<168x128xbf16>
    %c0_4 = arith.constant 0 : index
    %c0_5 = arith.constant 0 : index
    %5 = vector.load %arg4[%c0_4, %c0_5] : memref<128x128xbf16, #tpu.memory_space<vmem>>, vector<128x128xbf16>
    %cst = arith.constant dense<0.000000e+00> : vector<168x128xf32>
    %6 = tpu.matmul %4, %5, %cst {dimension_numbers = #tpu.dot_dimension_numbers<[1], [0], [0], [1], [0, 0, 1, 1], [], []>} : vector<168x128xbf16>, vector<128x128xbf16>, vector<168x128xf32> -> vector<168x128xf32>
    %7 = arith.addf %3, %6 : vector<168x128xf32>
    %c0_6 = arith.constant 0 : index
    %c0_7 = arith.constant 0 : index
    %8 = vector.load %arg7[%c0_6, %c0_7] : memref<168x128xf32, #tpu.memory_space<vmem>>, vector<168x128xf32>
    tpu.vector_store %arg7[%c0_6, %c0_7], %7 {strides = array<i32>} : memref<168x128xf32, #tpu.memory_space<vmem>>, vector<168x128xf32>,
    %c0_i32_8 = arith.constant 0 : i32
    %9 = arith.cmpi eq, %arg2, %c0_i32_8 : i32
    %10 = arith.extui %9 : i1 to i32
    %c0_i32_9 = arith.constant 0 : i32
    %11 = arith.cmpi ne, %10, %c0_i32_9 : i32
    scf.if %11 {
      %c0_10 = arith.constant 0 : index
      %c0_11 = arith.constant 0 : index
      %12 = vector.load %arg7[%c0_10, %c0_11] : memref<168x128xf32, #tpu.memory_space<vmem>>, vector<168x128xf32>
      %c0_12 = arith.constant 0 : index
      %c0_13 = arith.constant 0 : index
      %13 = vector.load %arg5[%c0_12, %c0_13] : memref<1x128xf32, #tpu.memory_space<vmem>>, vector<1x128xf32>
      %14 = vector.broadcast %13 : vector<1x128xf32> to vector<168x128xf32>
      %15 = arith.addf %12, %14 : vector<168x128xf32>
      %cst_14 = arith.constant 0.000000e+00 : f32
      %16 = vector.broadcast %cst_14 : f32 to vector<168x128xf32>
      %17 = arith.cmpf oge, %15, %16 : vector<168x128xf32>
      %cst_15 = arith.constant 2.000000e-01 : f32
      %18 = vector.broadcast %cst_15 : f32 to vector<168x128xf32>
      %19 = arith.mulf %18, %15 : vector<168x128xf32>
      %20 = arith.select %17, %15, %19 : vector<168x128xi1>, vector<168x128xf32>
      %c0_16 = arith.constant 0 : index
      %c0_17 = arith.constant 0 : index
      %21 = vector.load %arg6[%c0_16, %c0_17] : memref<168x128xf32, #tpu.memory_space<vmem>>, vector<168x128xf32>
      tpu.vector_store %arg6[%c0_16, %c0_17], %20 {strides = array<i32>} : memref<168x128xf32, #tpu.memory_space<vmem>>, vector<168x128xf32>,
    } else {
    }
    return
  }
  func.func @transform_0(%arg0: i32, %arg1: i32, %arg2: i32) -> (i32, i32) {
    %c0_i32 = arith.constant 0 : i32
    return %arg0, %arg2 : i32, i32
  }
  func.func @transform_1(%arg0: i32, %arg1: i32, %arg2: i32) -> (i32, i32) {
    %c0_i32 = arith.constant 0 : i32
    return %arg2, %arg1 : i32, i32
  }
  func.func @transform_2(%arg0: i32, %arg1: i32, %arg2: i32) -> (i32, i32) {
    %c0_i32 = arith.constant 0 : i32
    %c0_i32_0 = arith.constant 0 : i32
    return %c0_i32, %arg1 : i32, i32
  }
  func.func @transform_3(%arg0: i32, %arg1: i32, %arg2: i32) -> (i32, i32) {
    %c0_i32 = arith.constant 0 : i32
    return %arg0, %arg1 : i32, i32
  }
}

</mosaic_0001>

<bundles_post_ra>
// kernel: tpu_custom_call.1
= control target key start
LH: loop header
LB: loop body
LE: loop exit
PB: predicated region body
PF: predicated region fallthrough
CT: control target
= control target key end

     0   :  { %8 = vsyncpa [#allocation4], 0  ;;  %s866_s0 = inlined_call_operand.hbm [shape: bf16[168,128], index: 0, kind: input, shape index: {}]   ;;  %s867_s1 = inlined_call_operand.hbm [shape: bf16[128,128], index: 1, kind: input, shape index: {}]   ;;  %s868_s2 = inlined_call_operand.vmem [shape: f32[1,128], index: 2, kind: input, shape index: {}]   ;;  %s869_s3 = inlined_call_operand.hbm [shape: f32[168,128], index: 3, kind: output, shape index: {}]  }
   0x1   :  { %9 = vsyncpa [#allocation7], 0 }
   0x2   :  { %10 = vsyncpa [#allocation5], 0  ;;  %s764_s12 = smov [#allocation3]  }
   0x3   :  { %s16_s13 = sshll.u32 %s764_s12, 4  ;;  %s17_s13 = int_to_ptr.vmem [resolvable:$true] %s16_s13 }
   0x4   :  { %s706_s14 = scalar_lea.vmem %s17_s13, 1344  ;;  %p711_p1 = scmp.lt.s32.totalorder %s17_s13, %s17_s13 }
   0x5   :  { %p707_p0 = scmp.ne.s32.totalorder %s17_s13, %s706_s14  ;;  %p712_p2 = scmp.lt.s32.totalorder %s706_s14, %s706_s14 }
   0x7   :  { %p713_p3 = por %p712_p2, %p711_p1 }
   0x9   :  { %p714_p4 = pnand %p713_p3, %p707_p0 }
   0xb   :  { %717 = shalt.err (!%p714_p4)
}
   0xc   :  { %s765_s15 = smov 64   ;;  %s766_s16 = smov 4  }
   0xd   :  { %22 = dma.hbm_to_vmem [thread:$0]  %s866_s0, 1344, %s17_s13, [#allocation4], %s765_s15, %s765_s15, %s766_s16  }
   0xe   :  { %s767_s19 = smov [#allocation6]  }
   0xf   :  { %s28_s20 = sshll.u32 %s767_s19, 4  ;;  %s29_s20 = int_to_ptr.vmem [resolvable:$true] %s28_s20 }
  0x10   :  { %s726_s21 = scalar_lea.vmem %s29_s20, 1024  ;;  %p731_p6 = scmp.lt.s32.totalorder %s29_s20, %s29_s20 }
  0x11   :  { %p727_p5 = scmp.ne.s32.totalorder %s29_s20, %s726_s21  ;;  %p732_p7 = scmp.lt.s32.totalorder %s726_s21, %s726_s21 }
  0x13   :  { %p733_p8 = por %p732_p7, %p731_p6 }
  0x15   :  { %p734_p9 = pnand %p733_p8, %p727_p5 }
  0x17   :  { %737 = shalt.err (!%p734_p9)
}
  0x18   :  { %34 = dma.hbm_to_vmem [thread:$0]  %s867_s1, 1024, %s29_s20, [#allocation7], %s765_s15, %s765_s15, %s766_s16  }
  0x19   :  { %758 = dma.done.wait [#allocation4], 1344  }
  0x1a   :  { %759 = vsyncadd [#allocation4], 4294965952 }
  0x1b   :  { %760 = dma.done.wait [#allocation7], 1024  }
  0x1c   :  { %761 = vsyncadd [#allocation7], 4294966272  ;;  %v768_v0 = vmov 0.0   ;;  %vm769_vm0 = vmmov 0   ;;  %v679_v1 = vld [vmem:[#allocation6 + $0x38] sm:$0xff]   ;;  %v680_v2 = vld [vmem:[#allocation6 + $0x30] sm:$0xff]  }
  0x1d   :  { %594 = vmatprep.subr.bf16.mxu0 %v768_v0  ;;  %654 = vmatprep.subr.bf16.mxu1 %v768_v0  ;;  %v681_v3 = vld [vmem:[#allocation6 + $0x28] sm:$0xff]   ;;  %v682_v4 = vld [vmem:[#allocation6 + $0x20] sm:$0xff]   ;;  %v683_v5 = vld [vmem:[#allocation6 + $0x18] sm:$0xff]  }
  0x1e   :  { %610 = vmatprep.mubr.msk.bf16.mxu0 %vm769_vm0, %v768_v0  ;;  %634 = vmatprep.mubr.msk.bf16.mxu1 %vm769_vm0, %v768_v0  ;;  %v684_v6 = vld [vmem:[#allocation6 + $0x10] sm:$0xff]   ;;  %v685_v7 = vld [vmem:[#allocation6 + $0x8] sm:$0xff]   ;;  %v686_v8 = vld [vmem:[#allocation6] sm:$0xff]  }
  0x1f   :  { %595 = vmatpush3.bf16.msra.mxu0 %v679_v1  ;;  %662 = vmatpush3.bf16.msra.mxu1 %v679_v1  ;;  %v687_v9 = vld [vmem:[#allocation3] sm:$0xff]   ;;  %v688_v10 = vld [vmem:[#allocation3 + $0x30] sm:$0xff]   ;;  %v689_v11 = vld [vmem:[#allocation3 + $0x8] sm:$0xff]  }
  0x20   :  { %596 = vmatprep.subr.bf16.mxu0 %v768_v0  ;;  %655 = vmatprep.subr.bf16.mxu1 %v768_v0  ;;  %v690_v12 = vld [vmem:[#allocation3 + $0x38] sm:$0xff]   ;;  %v691_v13 = vld [vmem:[#allocation3 + $0x10] sm:$0xff]   ;;  %v692_v14 = vld [vmem:[#allocation3 + $0x40] sm:$0xff]  }
  0x21   :  { %v693_v15 = vld [vmem:[#allocation3 + $0x18] sm:$0xff]   ;;  %v694_v16 = vld [vmem:[#allocation3 + $0x48] sm:$0xff]   ;;  %v695_v17 = vld [vmem:[#allocation3 + $0x20] sm:$0xff]  }
  0x22   :  { %v696_v18 = vld [vmem:[#allocation3 + $0x50] ss:$0 sps:$4 sm:$0xff]   ;;  %v697_v19 = vld [vmem:[#allocation3 + $0x28] sm:$0xff]   ;;  %v840_v20 = vld [vmem:[%s868_s2] ss:$0 sm:$0xff]  ;;  %s770_s2 = smov [#allocation8]  }
  0x23   :  { %597 = vmatpush3.bf16.msra.mxu0 %v680_v2  ;;  %663 = vmatpush3.bf16.msra.mxu1 %v680_v2  ;;  %s542_s24 = sshll.u32 %s770_s2, 4  ;;  %s543_s24 = int_to_ptr.vmem [resolvable:$true] %s542_s24 }
  0x24   :  { %598 = vmatprep.subr.bf16.mxu0 %v768_v0  ;;  %656 = vmatprep.subr.bf16.mxu1 %v768_v0  ;;  %s738_s25 = scalar_lea.vmem %s543_s24, 2688  ;;  %p743_p11 = scmp.lt.s32.totalorder %s543_s24, %s543_s24 }
  0x25   :  { %p739_p10 = scmp.ne.s32.totalorder %s543_s24, %s738_s25  ;;  %p744_p12 = scmp.lt.s32.totalorder %s738_s25, %s738_s25 }
  0x27   :  { %599 = vmatpush3.bf16.msra.mxu0 %v681_v3  ;;  %664 = vmatpush3.bf16.msra.mxu1 %v681_v3  ;;  %p745_p13 = por %p744_p12, %p743_p11 }
  0x28   :  { %600 = vmatprep.subr.bf16.mxu0 %v768_v0  ;;  %657 = vmatprep.subr.bf16.mxu1 %v768_v0 }
  0x29   :  { %p746_p0 = pnand %p745_p13, %p739_p10 }
  0x2b   :  { %601 = vmatpush3.bf16.msra.mxu0 %v682_v4  ;;  %665 = vmatpush3.bf16.msra.mxu1 %v682_v4 }
  0x2c   :  { %602 = vmatprep.subr.bf16.mxu0 %v768_v0  ;;  %658 = vmatprep.subr.bf16.mxu1 %v768_v0 }
  0x2f   :  { %603 = vmatpush3.bf16.msra.mxu0 %v683_v5  ;;  %666 = vmatpush3.bf16.msra.mxu1 %v683_v5 }
  0x30   :  { %604 = vmatprep.subr.bf16.mxu0 %v768_v0  ;;  %659 = vmatprep.subr.bf16.mxu1 %v768_v0 }
  0x33   :  { %605 = vmatpush3.bf16.msra.mxu0 %v684_v6  ;;  %667 = vmatpush3.bf16.msra.mxu1 %v684_v6 }
  0x34   :  { %606 = vmatprep.subr.bf16.mxu0 %v768_v0  ;;  %660 = vmatprep.subr.bf16.mxu1 %v768_v0 }
  0x37   :  { %607 = vmatpush3.bf16.msra.mxu0 %v685_v7  ;;  %668 = vmatpush3.bf16.msra.mxu1 %v685_v7 }
  0x38   :  { %608 = vmatprep.subr.bf16.mxu0 %v768_v0  ;;  %661 = vmatprep.subr.bf16.mxu1 %v768_v0 }
  0x3b   :  { %609 = vmatpush3.bf16.msra.mxu0 %v686_v8  ;;  %669 = vmatpush3.bf16.msra.mxu1 %v686_v8 }
  0x3e   :  { %611 = vmatmul.mubr.bf16.vlgmr.msra.gmra.mxu0 %v687_v9  ;;  %635 = vmatmul.mubr.bf16.vlgmr.msra.gmra.mxu1 %v688_v10 }
  0x3f   :  { %614 = vmatprep.mubr.msk.bf16.mxu0 %vm769_vm0, %v768_v0  ;;  %638 = vmatprep.mubr.msk.bf16.mxu1 %vm769_vm0, %v768_v0 }
  0x46   :  { %615 = vmatmul.mubr.bf16.gmra.mxu0 %v689_v11  ;;  %639 = vmatmul.mubr.bf16.gmra.mxu1 %v690_v12 }
  0x47   :  { %618 = vmatprep.mubr.msk.bf16.mxu0 %vm769_vm0, %v768_v0  ;;  %642 = vmatprep.mubr.msk.bf16.mxu1 %vm769_vm0, %v768_v0 }
  0x4e   :  { %619 = vmatmul.mubr.bf16.gmra.mxu0 %v691_v13  ;;  %643 = vmatmul.mubr.bf16.gmra.mxu1 %v692_v14 }
  0x4f   :  { %622 = vmatprep.mubr.msk.bf16.mxu0 %vm769_vm0, %v768_v0  ;;  %646 = vmatprep.mubr.msk.bf16.mxu1 %vm769_vm0, %v768_v0 }
  0x56   :  { %623 = vmatmul.mubr.bf16.gmra.mxu0 %v693_v15  ;;  %647 = vmatmul.mubr.bf16.gmra.mxu1 %v694_v16 }
  0x57   :  { %626 = vmatprep.mubr.msk.bf16.mxu0 %vm769_vm0, %v768_v0  ;;  %650 = vmatprep.mubr.msk.bf16.mxu1 %vm769_vm0, %v768_v0 }
  0x5e   :  { %627 = vmatmul.mubr.bf16.gmra.mxu0 %v695_v17  ;;  %651 = vmatmul.mubr.bf16.gmra.mxu1 %v696_v18 }
  0x5f   :  { %630 = vmatprep.mubr.msk.bf16.mxu0 %vm769_vm0, %v768_v0 }
  0x66   :  { %631 = vmatmul.mubr.bf16.gmra.mxu0 %v697_v19 }
  0xfe   :  { %v273_v21 = vpop.f32.mrf.mxu0  ;;  %v321_v22 = vpop.f32.mrf.mxu1 }
  0xff   :  { %v432_v23 = vadd.f32 %v840_v20, %v273_v21  ;;  %v444_v24 = vadd.f32 %v840_v20, %v321_v22 }
 0x100   :  { %v612_v25 = vpop.f32.mrf.mxu0  ;;  %v636_v26 = vpop.f32.mrf.mxu1 }
 0x101   :  { %vm453_vm1 = vcmp.ge.f32.partialorder %v432_v23, 0.0  ;;  %v474_v27 = vmul.f32 0.2, %v432_v23  ;;  %vm465_vm2 = vcmp.ge.f32.partialorder %v444_v24, 0.0  ;;  %v486_v28 = vmul.f32 0.2, %v444_v24 }
 0x102   :  { %v276_v29 = vpop.f32.mrf.mxu0  ;;  %v324_v30 = vpop.f32.mrf.mxu1 }
 0x103   :  { %v495_v31 = vsel %vm453_vm1, %v432_v23, %v474_v27  ;;  %v433_v32 = vadd.f32 %v840_v20, %v276_v29  ;;  %v507_v33 = vsel %vm465_vm2, %v444_v24, %v486_v28  ;;  %v445_v34 = vadd.f32 %v840_v20, %v324_v30 }
 0x104   :  { %516 = vst [vmem:[#allocation8] sm:$0xff] %v495_v31  ;;  %v613_v35 = vpop.f32.mrf.mxu0  ;;  %528 = vst [vmem:[#allocation8 + $0x60] sm:$0xff] %v507_v33  ;;  %v637_v36 = vpop.f32.mrf.mxu1 }
 0x105   :  { %vm454_vm3 = vcmp.ge.f32.partialorder %v433_v32, 0.0  ;;  %v475_v37 = vmul.f32 0.2, %v433_v32  ;;  %vm466_vm4 = vcmp.ge.f32.partialorder %v445_v34, 0.0  ;;  %v487_v38 = vmul.f32 0.2, %v445_v34 }
 0x106   :  { %v281_v39 = vpop.f32.mrf.mxu0  ;;  %v329_v40 = vpop.f32.mrf.mxu1 }
 0x107   :  { %v496_v41 = vsel %vm454_vm3, %v433_v32, %v475_v37  ;;  %v434_v42 = vadd.f32 %v840_v20, %v281_v39  ;;  %v508_v43 = vsel %vm466_vm4, %v445_v34, %v487_v38  ;;  %v446_v44 = vadd.f32 %v840_v20, %v329_v40 }
 0x108   :  { %517 = vst [vmem:[#allocation8 + $0x8] sm:$0xff] %v496_v41  ;;  %v616_v45 = vpop.f32.mrf.mxu0  ;;  %529 = vst [vmem:[#allocation8 + $0x68] sm:$0xff] %v508_v43  ;;  %v640_v46 = vpop.f32.mrf.mxu1 }
 0x109   :  { %vm455_vm5 = vcmp.ge.f32.partialorder %v434_v42, 0.0  ;;  %v476_v47 = vmul.f32 0.2, %v434_v42  ;;  %vm467_vm6 = vcmp.ge.f32.partialorder %v446_v44, 0.0  ;;  %v488_v48 = vmul.f32 0.2, %v446_v44 }
 0x10a   :  { %v284_v49 = vpop.f32.mrf.mxu0  ;;  %v332_v50 = vpop.f32.mrf.mxu1 }
 0x10b   :  { %v497_v51 = vsel %vm455_vm5, %v434_v42, %v476_v47  ;;  %v435_v52 = vadd.f32 %v840_v20, %v284_v49  ;;  %v509_v53 = vsel %vm467_vm6, %v446_v44, %v488_v48  ;;  %v447_v54 = vadd.f32 %v840_v20, %v332_v50 }
 0x10c   :  { %518 = vst [vmem:[#allocation8 + $0x10] sm:$0xff] %v497_v51  ;;  %v617_v55 = vpop.f32.mrf.mxu0  ;;  %530 = vst [vmem:[#allocation8 + $0x70] sm:$0xff] %v509_v53  ;;  %v641_v56 = vpop.f32.mrf.mxu1 }
 0x10d   :  { %vm456_vm7 = vcmp.ge.f32.partialorder %v435_v52, 0.0  ;;  %v477_v57 = vmul.f32 0.2, %v435_v52  ;;  %vm468_vm8 = vcmp.ge.f32.partialorder %v447_v54, 0.0  ;;  %v489_v58 = vmul.f32 0.2, %v447_v54 }
 0x10e   :  { %v289_v59 = vpop.f32.mrf.mxu0  ;;  %v337_v60 = vpop.f32.mrf.mxu1 }
 0x10f   :  { %v498_v61 = vsel %vm456_vm7, %v435_v52, %v477_v57  ;;  %v436_v62 = vadd.f32 %v840_v20, %v289_v59  ;;  %v510_v63 = vsel %vm468_vm8, %v447_v54, %v489_v58  ;;  %v448_v0 = vadd.f32 %v840_v20, %v337_v60 }
 0x110   :  { %519 = vst [vmem:[#allocation8 + $0x18] sm:$0xff] %v498_v61  ;;  %v620_v1 = vpop.f32.mrf.mxu0  ;;  %531 = vst [vmem:[#allocation8 + $0x78] sm:$0xff] %v510_v63  ;;  %v644_v2 = vpop.f32.mrf.mxu1 }
 0x111   :  { %vm457_vm9 = vcmp.ge.f32.partialorder %v436_v62, 0.0  ;;  %v478_v3 = vmul.f32 0.2, %v436_v62  ;;  %vm469_vm10 = vcmp.ge.f32.partialorder %v448_v0, 0.0  ;;  %v490_v4 = vmul.f32 0.2, %v448_v0 }
 0x112   :  { %v292_v5 = vpop.f32.mrf.mxu0  ;;  %v340_v6 = vpop.f32.mrf.mxu1 }
 0x113   :  { %v499_v7 = vsel %vm457_vm9, %v436_v62, %v478_v3  ;;  %v437_v8 = vadd.f32 %v840_v20, %v292_v5  ;;  %v511_v9 = vsel %vm469_vm10, %v448_v0, %v490_v4  ;;  %v449_v10 = vadd.f32 %v840_v20, %v340_v6 }
 0x114   :  { %520 = vst [vmem:[#allocation8 + $0x20] sm:$0xff] %v499_v7  ;;  %v621_v11 = vpop.f32.mrf.mxu0  ;;  %532 = vst [vmem:[#allocation8 + $0x80] sm:$0xff] %v511_v9  ;;  %v645_v12 = vpop.f32.mrf.mxu1 }
 0x115   :  { %vm458_vm11 = vcmp.ge.f32.partialorder %v437_v8, 0.0  ;;  %v479_v13 = vmul.f32 0.2, %v437_v8  ;;  %vm470_vm12 = vcmp.ge.f32.partialorder %v449_v10, 0.0  ;;  %v491_v14 = vmul.f32 0.2, %v449_v10 }
 0x116   :  { %v297_v15 = vpop.f32.mrf.mxu0  ;;  %v345_v16 = vpop.f32.mrf.mxu1 }
 0x117   :  { %v500_v17 = vsel %vm458_vm11, %v437_v8, %v479_v13  ;;  %v438_v18 = vadd.f32 %v840_v20, %v297_v15  ;;  %v512_v19 = vsel %vm470_vm12, %v449_v10, %v491_v14  ;;  %v450_v21 = vadd.f32 %v840_v20, %v345_v16 }
 0x118   :  { %521 = vst [vmem:[#allocation8 + $0x28] sm:$0xff] %v500_v17  ;;  %v624_v22 = vpop.f32.mrf.mxu0  ;;  %533 = vst [vmem:[#allocation8 + $0x88] sm:$0xff] %v512_v19  ;;  %v648_v23 = vpop.f32.mrf.mxu1 }
 0x119   :  { %vm459_vm13 = vcmp.ge.f32.partialorder %v438_v18, 0.0  ;;  %v480_v24 = vmul.f32 0.2, %v438_v18  ;;  %vm471_vm14 = vcmp.ge.f32.partialorder %v450_v21, 0.0  ;;  %v492_v25 = vmul.f32 0.2, %v450_v21 }
 0x11a   :  { %v300_v26 = vpop.f32.mrf.mxu0  ;;  %v348_v27 = vpop.f32.mrf.mxu1 }
 0x11b   :  { %v501_v28 = vsel %vm459_vm13, %v438_v18, %v480_v24  ;;  %v439_v29 = vadd.f32 %v840_v20, %v300_v26  ;;  %v513_v30 = vsel %vm471_vm14, %v450_v21, %v492_v25  ;;  %v451_v31 = vadd.f32 %v840_v20, %v348_v27 }
 0x11c   :  { %522 = vst [vmem:[#allocation8 + $0x30] sm:$0xff] %v501_v28  ;;  %v625_v32 = vpop.f32.mrf.mxu0  ;;  %534 = vst [vmem:[#allocation8 + $0x90] sm:$0xff] %v513_v30  ;;  %v649_v33 = vpop.f32.mrf.mxu1 }
 0x11d   :  { %vm460_vm15 = vcmp.ge.f32.partialorder %v439_v29, 0.0  ;;  %v481_v34 = vmul.f32 0.2, %v439_v29  ;;  %vm472_vm0 = vcmp.ge.f32.partialorder %v451_v31, 0.0  ;;  %v493_v35 = vmul.f32 0.2, %v451_v31 }
 0x11e   :  { %v305_v36 = vpop.f32.mrf.mxu0  ;;  %v353_v37 = vpop.f32.mrf.mxu1 }
 0x11f   :  { %v502_v38 = vsel %vm460_vm15, %v439_v29, %v481_v34  ;;  %v440_v39 = vadd.f32 %v840_v20, %v305_v36  ;;  %v514_v40 = vsel %vm472_vm0, %v451_v31, %v493_v35  ;;  %v452_v41 = vadd.f32 %v840_v20, %v353_v37 }
 0x120   :  { %523 = vst [vmem:[#allocation8 + $0x38] sm:$0xff] %v502_v38  ;;  %v628_v42 = vpop.f32.mrf.mxu0  ;;  %535 = vst [vmem:[#allocation8 + $0x98] sm:$0xff] %v514_v40  ;;  %v652_v43 = vpop.f32.mrf.mxu1 }
 0x121   :  { %vm461_vm1 = vcmp.ge.f32.partialorder %v440_v39, 0.0  ;;  %v482_v44 = vmul.f32 0.2, %v440_v39  ;;  %vm473_vm2 = vcmp.ge.f32.partialorder %v452_v41, 0.0  ;;  %v494_v45 = vmul.f32 0.2, %v452_v41 }
 0x122   :  { %v308_v46 = vpop.f32.mrf.mxu0  ;;  %v356_v47 = vpop.f32.mrf.mxu1 }
 0x123   :  { %v503_v48 = vsel %vm461_vm1, %v440_v39, %v482_v44  ;;  %v441_v49 = vadd.f32 %v840_v20, %v308_v46  ;;  %v515_v50 = vsel %vm473_vm2, %v452_v41, %v494_v45 }
 0x124   :  { %524 = vst [vmem:[#allocation8 + $0x40] sm:$0xff] %v503_v48  ;;  %v629_v51 = vpop.f32.mrf.mxu0  ;;  %536 = vst [vmem:[#allocation8 + $0xa0] sm:$0xff] %v515_v50  ;;  %v653_v52 = vpop.f32.mrf.mxu1 }
 0x125   :  { %vm462_vm3 = vcmp.ge.f32.partialorder %v441_v49, 0.0  ;;  %v483_v53 = vmul.f32 0.2, %v441_v49 }
 0x126   :  { %v313_v54 = vpop.f32.mrf.mxu0 }
 0x127   :  { %v504_v55 = vsel %vm462_vm3, %v441_v49, %v483_v53  ;;  %v442_v56 = vadd.f32 %v840_v20, %v313_v54 }
 0x128   :  { %525 = vst [vmem:[#allocation8 + $0x48] sm:$0xff] %v504_v55  ;;  %v632_v57 = vpop.f32.mrf.mxu0 }
 0x129   :  { %vm463_vm4 = vcmp.ge.f32.partialorder %v442_v56, 0.0  ;;  %v484_v58 = vmul.f32 0.2, %v442_v56 }
 0x12a   :  { %v316_v59 = vpop.f32.mrf.mxu0 }
 0x12b   :  { %v505_v60 = vsel %vm463_vm4, %v442_v56, %v484_v58  ;;  %v443_v61 = vadd.f32 %v840_v20, %v316_v59 }
 0x12c   :  { %526 = vst [vmem:[#allocation8 + $0x50] sm:$0xff] %v505_v60  ;;  %v633_v62 = vpop.f32.mrf.mxu0 }
 0x12d   :  { %vm464_vm5 = vcmp.ge.f32.partialorder %v443_v61, 0.0  ;;  %v485_v63 = vmul.f32 0.2, %v443_v61 }
 0x12f   :  { %v506_v0 = vsel %vm464_vm5, %v443_v61, %v485_v63 }
 0x130   :  { %527 = vst [vmem:[#allocation8 + $0x58] sm:$0xff] %v506_v0 }
 0x131   :  { %749 = shalt.err (!%p746_p0)
}
 0x132   :  { %s771_s26 = smov 128   ;;  %s772_s27 = smov 8  }
 0x133   :  { %548 = dma.vmem_to_hbm [thread:$0]  %s543_s24, 2688, %s869_s3, [#allocation5], %s771_s26, %s771_s26, %s772_s27  }
 0x134   :  { %762 = dma.done.wait [#allocation5], 2688  }
 0x135   :  { %763 = vsyncadd [#allocation5], 4294964608 }
 0x136   :  { %552 = vsyncpa [#allocation4], 1 }
 0x137   :  { %553 = vsyncpa [#allocation7], 1 }
 0x138   :  { %554 = vsyncpa [#allocation5], 1 }

</bundles_post_ra>
